<compile_context>
chip_gen: v7x
topology: tpu7x:2x2x1
jax: 0.10.0
libtpu: 0.0.40
codegen_flags: <defaults>
</compile_context>

<pallas_src>
import functools

import jax
import jax.numpy as jnp
from jax.experimental import pallas as pl
from jax.experimental.pallas import tpu as pltpu


def _parallel_linear_kernel(x_ref, w_ref, b_ref, o_ref, *,
                            n_split, split_inp, split_out):
    # x_ref: (TILE_BT, F)             w_ref: (n_split, split_inp, split_out)
    # b_ref: (n_split, split_out)     o_ref: (TILE_BT, n_neurons)
    outs = []
    for m in range(n_split):                      # n_split is small & static
        xm = x_ref[:, m * split_inp:(m + 1) * split_inp]
        acc = jnp.dot(xm, w_ref[m], preferred_element_type=jnp.float32)
        outs.append(acc + b_ref[m][None, :].astype(jnp.float32))
    y = outs[0] if n_split == 1 else jnp.concatenate(outs, axis=-1)
    o_ref[...] = y.astype(o_ref.dtype)            # single lane-dense store


def _choose_tile_bt(bt, feat, n_neurons, itemsize):
    """Pick a row-tile: big enough to amortize per-step overhead, small enough
    that 2x(x tile)+2x(out tile) stays ~<=16 MiB (safe on v7x's 64 MiB VMEM)."""
    budget = 16 * 1024 * 1024
    per_row = 2 * (feat + n_neurons) * itemsize
    max_rows = max(8, budget // max(per_row, 1))
    tile = int(min(512, max_rows))
    tile -= tile % 8                              # (8,128) sublane alignment
    tile = max(tile, 8)
    if bt <= tile:
        return bt                                 # full-dim block always legal
    return tile


def parallel_linear(x, weights, biases, combine_out_dims=True,
                    operand_dtype=None):
    """y = einsum('btmf,mfh->btmh', x, W) + b   (ParallelLinear.forward)

    x        : [B, T, F] or [B, T, n_split, F//n_split]
    weights  : [n_split, split_inp_dim, split_out_dim]
    biases   : [n_split, split_out_dim]
    operand_dtype : optional dtype (e.g. jnp.bfloat16) for x/W matmul operands;
                    accumulation stays f32, output keeps x's dtype.
    """
    n_split, split_inp, split_out = weights.shape
    feat = n_split * split_inp
    n_neurons = n_split * split_out

    if x.ndim == 4:
        B, T, m, f = x.shape
        assert m == n_split and f == split_inp
        x2 = x.reshape(B, T, feat)                # contiguous -> free reshape
    else:
        B, T, F = x.shape
        assert F == feat
        x2 = x
    out_dtype = x.dtype
    BT = B * T
    x2 = x2.reshape(BT, feat)                     # free reshape, no transpose

    if operand_dtype is not None:
        x2 = x2.astype(operand_dtype)
        weights = weights.astype(operand_dtype)

    itemsize = jnp.dtype(x2.dtype).itemsize
    tile_bt = _choose_tile_bt(BT, feat, n_neurons, itemsize)
    grid_rows = pl.cdiv(BT, tile_bt)

    w_bytes = weights.size * jnp.dtype(weights.dtype).itemsize
    b_bytes = biases.size * jnp.dtype(biases.dtype).itemsize
    o_itemsize = jnp.dtype(out_dtype).itemsize
    vmem_need = (2 * tile_bt * feat * itemsize
                 + 2 * tile_bt * n_neurons * o_itemsize
                 + 2 * (w_bytes + b_bytes))
    vmem_limit = int(min(60 * 1024 * 1024,
                         max(32 * 1024 * 1024, 2 * vmem_need)))

    cost = pl.CostEstimate(
        flops=2 * BT * feat * split_out,
        transcendentals=0,
        bytes_accessed=(BT * feat * itemsize + w_bytes + b_bytes
                        + BT * n_neurons * o_itemsize),
    )

    kernel = functools.partial(
        _parallel_linear_kernel,
        n_split=n_split, split_inp=split_inp, split_out=split_out)

    out = pl.pallas_call(
        kernel,
        out_shape=jax.ShapeDtypeStruct((BT, n_neurons), out_dtype),
        grid_spec=pltpu.PrefetchScalarGridSpec(
            num_scalar_prefetch=0,
            grid=(grid_rows,),
            in_specs=[
                # activations: tiled along rows, full feature dim (lane-dense)
                pl.BlockSpec((tile_bt, feat), lambda i: (i, 0)),
                # weights/biases: whole arrays, resident across all row tiles
                pl.BlockSpec((n_split, split_inp, split_out),
                             lambda i: (0, 0, 0)),
                pl.BlockSpec((n_split, split_out), lambda i: (0, 0)),
            ],
            out_specs=pl.BlockSpec((tile_bt, n_neurons), lambda i: (i, 0)),
        ),
        compiler_params=pltpu.CompilerParams(
            dimension_semantics=("parallel",),
            vmem_limit_bytes=vmem_limit,
        ),
        cost_estimate=cost,
    )(x2, weights, biases)

    out = out.reshape(B, T, n_neurons)            # free reshape
    if not combine_out_dims:
        out = out.reshape(B, T, n_split, split_out)
    return out


def init_parallel_linear_params(key, n_neurons, input_size, n_split):
    """Deterministic kaiming-uniform-like init (shapes match the PyTorch module)."""
    split_inp = input_size // n_split
    split_out = n_neurons // n_split
    kw, kb = jax.random.split(key)
    fan_in_w = split_inp * split_out
    bound_w = 1.0 / jnp.sqrt(fan_in_w)
    weights = jax.random.uniform(
        kw, (n_split, split_inp, split_out), jnp.float32, -bound_w, bound_w)
    fan_in_b = split_out
    bound_b = 1.0 / jnp.sqrt(fan_in_b)
    biases = jax.random.uniform(
        kb, (n_split, split_out), jnp.float32, -bound_b, bound_b)
    return weights, biases


if __name__ == "__main__":
    B, T, F = 2, 8, 32
    n_split = 4
    n_neurons = 16

    key = jax.random.PRNGKey(0)
    kx, kp = jax.random.split(key)
    x = jax.random.normal(kx, (B, T, F), jnp.float32)
    weights, biases = init_parallel_linear_params(kp, n_neurons, F, n_split)

    y = parallel_linear(x, weights, biases, combine_out_dims=True)
    y = jax.block_until_ready(y)

    # reference (pure JAX) check of forward semantics
    x4 = x.reshape(B, T, n_split, F // n_split)
    ref = jnp.einsum("btmf,mfh->btmh", x4, weights) + biases
    ref = ref.reshape(B, T, n_neurons)
    assert y.shape == (B, T, n_neurons)
    assert jnp.allclose(y, ref, atol=1e-5, rtol=1e-5)

    # also exercise the 4-D input / combine_out_dims=False path
    y4 = parallel_linear(x4, weights, biases, combine_out_dims=False)
    y4 = jax.block_until_ready(y4)
    assert y4.shape == (B, T, n_split, n_neurons // n_split)
    assert jnp.allclose(y4.reshape(B, T, n_neurons), ref, atol=1e-5, rtol=1e-5)

    print("KERNEL_OK")
</pallas_src>

<mosaic_0001>
module attributes {stable_mosaic.version = 11 : i64} {
  func.func @_parallel_linear_kernel(%arg0: i32, %arg1: memref<16x32xf32, #tpu.memory_space<vmem>>, %arg2: memref<4x8x4xf32, #tpu.memory_space<vmem>>, %arg3: memref<4x4xf32, #tpu.memory_space<vmem>>, %arg4: memref<16x16xf32, #tpu.memory_space<vmem>>) attributes {dimension_semantics = [#tpu.dimension_semantics<parallel>], iteration_bounds = array<i64: 1>, scalar_prefetch = 0 : i64, scratch_operands = 0 : i64, tpu.core_type = #tpu.core_type<tc>, window_params = [{transform_indices = @transform_0, window_bounds = array<i64: 16, 32>}, {pipeline_mode = #tpu.pipeline_mode<synchronous>, transform_indices = @transform_1, window_bounds = array<i64: 4, 8, 4>}, {pipeline_mode = #tpu.pipeline_mode<synchronous>, transform_indices = @transform_2, window_bounds = array<i64: 4, 4>}, {transform_indices = @transform_3, window_bounds = array<i64: 16, 16>}]} {
    %c0 = arith.constant 0 : index
    %c0_0 = arith.constant 0 : index
    %0 = vector.load %arg1[%c0, %c0_0] : memref<16x32xf32, #tpu.memory_space<vmem>>, vector<16x8xf32>
    %c0_1 = arith.constant 0 : index
    %c0_2 = arith.constant 0 : index
    %c0_3 = arith.constant 0 : index
    %1 = vector.load %arg2[%c0_1, %c0_2, %c0_3] : memref<4x8x4xf32, #tpu.memory_space<vmem>>, vector<1x8x4xf32>
    %2 = vector.shape_cast %1 : vector<1x8x4xf32> to vector<8x4xf32>
    %cst = arith.constant dense<0.000000e+00> : vector<16x4xf32>
    %3 = tpu.matmul %0, %2, %cst {dimension_numbers = #tpu.dot_dimension_numbers<[1], [0], [0], [1], [0, 0, 1, 1], [], []>} : vector<16x8xf32>, vector<8x4xf32>, vector<16x4xf32> -> vector<16x4xf32>
    %c0_4 = arith.constant 0 : index
    %c0_5 = arith.constant 0 : index
    %4 = vector.load %arg3[%c0_4, %c0_5] : memref<4x4xf32, #tpu.memory_space<vmem>>, vector<1x4xf32>
    %5 = vector.shape_cast %4 : vector<1x4xf32> to vector<4xf32>
    %6 = vector.shape_cast %5 : vector<4xf32> to vector<1x4xf32>
    %7 = vector.broadcast %6 : vector<1x4xf32> to vector<16x4xf32>
    %8 = arith.addf %3, %7 : vector<16x4xf32>
    %c0_6 = arith.constant 0 : index
    %c8 = arith.constant 8 : index
    %9 = vector.load %arg1[%c0_6, %c8] : memref<16x32xf32, #tpu.memory_space<vmem>>, vector<16x8xf32>
    %c1 = arith.constant 1 : index
    %c0_7 = arith.constant 0 : index
    %c0_8 = arith.constant 0 : index
    %10 = vector.load %arg2[%c1, %c0_7, %c0_8] : memref<4x8x4xf32, #tpu.memory_space<vmem>>, vector<1x8x4xf32>
    %11 = vector.shape_cast %10 : vector<1x8x4xf32> to vector<8x4xf32>
    %cst_9 = arith.constant dense<0.000000e+00> : vector<16x4xf32>
    %12 = tpu.matmul %9, %11, %cst_9 {dimension_numbers = #tpu.dot_dimension_numbers<[1], [0], [0], [1], [0, 0, 1, 1], [], []>} : vector<16x8xf32>, vector<8x4xf32>, vector<16x4xf32> -> vector<16x4xf32>
    %c1_10 = arith.constant 1 : index
    %c0_11 = arith.constant 0 : index
    %13 = vector.load %arg3[%c1_10, %c0_11] : memref<4x4xf32, #tpu.memory_space<vmem>>, vector<1x4xf32>
    %14 = vector.shape_cast %13 : vector<1x4xf32> to vector<4xf32>
    %15 = vector.shape_cast %14 : vector<4xf32> to vector<1x4xf32>
    %16 = vector.broadcast %15 : vector<1x4xf32> to vector<16x4xf32>
    %17 = arith.addf %12, %16 : vector<16x4xf32>
    %c0_12 = arith.constant 0 : index
    %c16 = arith.constant 16 : index
    %18 = vector.load %arg1[%c0_12, %c16] : memref<16x32xf32, #tpu.memory_space<vmem>>, vector<16x8xf32>
    %c2 = arith.constant 2 : index
    %c0_13 = arith.constant 0 : index
    %c0_14 = arith.constant 0 : index
    %19 = vector.load %arg2[%c2, %c0_13, %c0_14] : memref<4x8x4xf32, #tpu.memory_space<vmem>>, vector<1x8x4xf32>
    %20 = vector.shape_cast %19 : vector<1x8x4xf32> to vector<8x4xf32>
    %cst_15 = arith.constant dense<0.000000e+00> : vector<16x4xf32>
    %21 = tpu.matmul %18, %20, %cst_15 {dimension_numbers = #tpu.dot_dimension_numbers<[1], [0], [0], [1], [0, 0, 1, 1], [], []>} : vector<16x8xf32>, vector<8x4xf32>, vector<16x4xf32> -> vector<16x4xf32>
    %c2_16 = arith.constant 2 : index
    %c0_17 = arith.constant 0 : index
    %22 = vector.load %arg3[%c2_16, %c0_17] : memref<4x4xf32, #tpu.memory_space<vmem>>, vector<1x4xf32>
    %23 = vector.shape_cast %22 : vector<1x4xf32> to vector<4xf32>
    %24 = vector.shape_cast %23 : vector<4xf32> to vector<1x4xf32>
    %25 = vector.broadcast %24 : vector<1x4xf32> to vector<16x4xf32>
    %26 = arith.addf %21, %25 : vector<16x4xf32>
    %c0_18 = arith.constant 0 : index
    %c24 = arith.constant 24 : index
    %27 = vector.load %arg1[%c0_18, %c24] : memref<16x32xf32, #tpu.memory_space<vmem>>, vector<16x8xf32>
    %c3 = arith.constant 3 : index
    %c0_19 = arith.constant 0 : index
    %c0_20 = arith.constant 0 : index
    %28 = vector.load %arg2[%c3, %c0_19, %c0_20] : memref<4x8x4xf32, #tpu.memory_space<vmem>>, vector<1x8x4xf32>
    %29 = vector.shape_cast %28 : vector<1x8x4xf32> to vector<8x4xf32>
    %cst_21 = arith.constant dense<0.000000e+00> : vector<16x4xf32>
    %30 = tpu.matmul %27, %29, %cst_21 {dimension_numbers = #tpu.dot_dimension_numbers<[1], [0], [0], [1], [0, 0, 1, 1], [], []>} : vector<16x8xf32>, vector<8x4xf32>, vector<16x4xf32> -> vector<16x4xf32>
    %c3_22 = arith.constant 3 : index
    %c0_23 = arith.constant 0 : index
    %31 = vector.load %arg3[%c3_22, %c0_23] : memref<4x4xf32, #tpu.memory_space<vmem>>, vector<1x4xf32>
    %32 = vector.shape_cast %31 : vector<1x4xf32> to vector<4xf32>
    %33 = vector.shape_cast %32 : vector<4xf32> to vector<1x4xf32>
    %34 = vector.broadcast %33 : vector<1x4xf32> to vector<16x4xf32>
    %35 = arith.addf %30, %34 : vector<16x4xf32>
    %36 = tpu.concatenate %8, %17, %26, %35 in 1 : vector<16x4xf32>, vector<16x4xf32>, vector<16x4xf32>, vector<16x4xf32> -> vector<16x16xf32>
    %c0_24 = arith.constant 0 : index
    %c0_25 = arith.constant 0 : index
    %37 = vector.load %arg4[%c0_24, %c0_25] : memref<16x16xf32, #tpu.memory_space<vmem>>, vector<16x16xf32>
    tpu.vector_store %arg4[%c0_24, %c0_25], %36 {strides = array<i32>} : memref<16x16xf32, #tpu.memory_space<vmem>>, vector<16x16xf32>,
    return
  }
  func.func @transform_0(%arg0: i32) -> (i32, i32) {
    %c0_i32 = arith.constant 0 : i32
    %c0_i32_0 = arith.constant 0 : i32
    return %arg0, %c0_i32 : i32, i32
  }
  func.func @transform_1(%arg0: i32) -> (i32, i32, i32) {
    %c0_i32 = arith.constant 0 : i32
    %c0_i32_0 = arith.constant 0 : i32
    %c0_i32_1 = arith.constant 0 : i32
    %c0_i32_2 = arith.constant 0 : i32
    return %c0_i32, %c0_i32_0, %c0_i32_1 : i32, i32, i32
  }
  func.func @transform_2(%arg0: i32) -> (i32, i32) {
    %c0_i32 = arith.constant 0 : i32
    %c0_i32_0 = arith.constant 0 : i32
    %c0_i32_1 = arith.constant 0 : i32
    return %c0_i32, %c0_i32_0 : i32, i32
  }
  func.func @transform_3(%arg0: i32) -> (i32, i32) {
    %c0_i32 = arith.constant 0 : i32
    %c0_i32_0 = arith.constant 0 : i32
    return %arg0, %c0_i32 : i32, i32
  }
}

</mosaic_0001>

<bundles_post_ra>
// kernel: tpu_custom_call.1
= control target key start
LH: loop header
LB: loop body
LE: loop exit
PB: predicated region body
PF: predicated region fallthrough
CT: control target
= control target key end

     0   :  { %s505_s16 = smov 120   ;;  %s506_s17 = smov 112   ;;  %vm23_vm0 = vcmask 64512   ;;  %s588_s0 = inlined_call_operand.vmem [shape: f32[16,32], index: 0, kind: input, shape index: {}]   ;;  %s589_s1 = inlined_call_operand.vmem [shape: f32[4,8,4], index: 1, kind: input, shape index: {}]   ;;  %s590_s2 = inlined_call_operand.vmem [shape: f32[4,4], index: 2, kind: input, shape index: {}]   ;;  %s591_s3 = inlined_call_operand.hbm [shape: f32[16,16], index: 3, kind: output, shape index: {}]  }
   0x1   :  { %v15_v0 = vld [vmem:[%s588_s0] sm:$0xff]  ;;  %v429_v2 = vld [vmem:[%s589_s1 + $0x8] sm:$0xff]  ;;  %v433_v3 = vld [vmem:[%s589_s1 + $0x10] sm:$0xff] }
   0x2   :  { %v17_v1 = vld [vmem:[%s589_s1] sm:$0xff]  ;;  %112 = vrot.lane.b32.xlu0 %v15_v0, %s505_s16  ;;  %202 = vrot.lane.b32.xlu1 %v15_v0, %s506_s17  ;;  %v16_v4 = vld [vmem:[%s588_s0 + $0x8] sm:$0xff] }
   0x3   :  { %453 = vmatprep.subr.mxu0 %v17_v1  ;;  %458 = vmatprep.subr.mxu1 %v429_v2 }
   0x4   :  { %8 = vsyncpa [#allocation3], 0  ;;  %454 = vmatpush3.msra.mxu0 %v17_v1  ;;  %455 = vmatprep.mubr.msk.f32.mxu0 %vm23_vm0, %v15_v0  ;;  %v437_v5 = vld [vmem:[%s589_s1 + $0x18] sm:$0xff]  ;;  %s507_s0 = smov 104   ;;  %v430_v14 = vld [vmem:[%s590_s2 + $0x1] ss:$0 sm:$0xff] }
   0x5   :  { %459 = vmatpush3.msra.mxu1 %v429_v2  ;;  %463 = vmatprep.subr.mxu0 %v433_v3  ;;  %v434_v17 = vld [vmem:[%s590_s2 + $0x2] ss:$0 sm:$0xff]  ;;  %s508_s29 = smov 4   ;;  %v438_v24 = vld [vmem:[%s590_s2 + $0x3] ss:$0 sm:$0xff]  ;;  %s509_s5 = smov 8  }
   0x6   :  { %114 = vrot.lane.b32.xlu0 %v16_v4, %s505_s16  ;;  %204 = vrot.lane.b32.xlu1 %v16_v4, %s506_s17  ;;  %s510_s6 = smov 12   ;;  %v426_v31 = vld [vmem:[%s590_s2] ss:$0 sm:$0xff]  ;;  %vm399_vm1 = vcmask 31744   ;;  %vm404_vm2 = vcmask 97280   ;;  %s511_s9 = smov [#allocation2]  }
   0x7   :  { %456 = vmatmul.mubr.msk.f32.vlgmr.msra.gmra.mrb[0].mxu0 %vm23_vm0, %v16_v4  ;;  %468 = vmatprep.subr.mxu1 %v437_v5  ;;  %s415_s10 = sshll.u32 %s511_s9, 4  ;;  %vm407_vm3 = vcmask 130048   ;;  %s416_s10 = int_to_ptr.vmem [resolvable:$true] %s415_s10 }
   0x8   :  { %464 = vmatpush3.msra.mxu0 %v433_v3  ;;  %s481_s2 = scalar_lea.vmem %s416_s10, 256  ;;  %p486_p1 = scmp.lt.s32.totalorder %s416_s10, %s416_s10 }
   0x9   :  { %p482_p0 = scmp.ne.s32.totalorder %s416_s10, %s481_s2  ;;  %p487_p2 = scmp.lt.s32.totalorder %s481_s2, %s481_s2 }
   0xa   :  { %292 = vrot.lane.b32.xlu0 %v15_v0, %s507_s0  ;;  %294 = vrot.lane.b32.xlu1 %v16_v4, %s507_s0 }
   0xb   :  { %p488_p3 = por %p487_p2, %p486_p1 }
   0xd   :  { %p489_p4 = pnand %p488_p3, %p482_p0 }
  0x74   :  { %v113_v6 = vpop.permute.xlu0 %112  ;;  %v203_v7 = vpop.permute.xlu1 %202 }
  0x75   :  { %460 = vmatprep.mubr.msk.f32.mxu1 %vm23_vm0, %v113_v6  ;;  %465 = vmatprep.mubr.msk.f32.mxu0 %vm23_vm0, %v203_v7 }
  0x78   :  { %v115_v8 = vpop.permute.xlu0 %114  ;;  %v205_v9 = vpop.permute.xlu1 %204 }
  0x79   :  { %461 = vmatmul.mubr.msk.f32.vlgmr.msra.gmra.mrb[0].mxu1 %vm23_vm0, %v115_v8  ;;  %466 = vmatmul.mubr.msk.f32.vlgmr.msra.gmra.mrb[2].mxu0 %vm23_vm0, %v205_v9 }
  0x7a   :  { %469 = vmatpush3.msra.mxu1 %v437_v5 }
  0x7c   :  { %v293_v10 = vpop.permute.xlu0 %292  ;;  %v295_v11 = vpop.permute.xlu1 %294 }
  0x7d   :  { %470 = vmatprep.mubr.msk.f32.mxu1 %vm23_vm0, %v293_v10 }
  0x7e   :  { %471 = vmatmul.mubr.msk.f32.vlgmr.msra.gmra.mrb[2].mxu1 %vm23_vm0, %v295_v11 }
  0xda   :  { %v457_v12 = vpop.f32.mrb[0].mxu0 }
  0xdb   :  { %v96_v13 = vpop.f32.mrb[1].mxu0  ;;  %v102_v33 = vadd.f32 %v457_v12, %v426_v31 }
  0xdc   :  { %v97_v35 = vadd.f32 %v426_v31, %v96_v13 }
 0x14c   :  { %v462_v15 = vpop.f32.mrb[0].mxu1  ;;  %v467_v16 = vpop.f32.mrb[2].mxu0 }
 0x14d   :  { %v192_v18 = vadd.f32 %v462_v15, %v430_v14  ;;  %v186_v19 = vpop.f32.mrb[1].mxu1  ;;  %v276_v20 = vpop.f32.mrb[3].mxu0  ;;  %v282_v22 = vadd.f32 %v467_v16, %v434_v17 }
 0x14e   :  { %v187_v21 = vadd.f32 %v430_v14, %v186_v19  ;;  %v277_v23 = vadd.f32 %v434_v17, %v276_v20 }
 0x14f   :  { %379 = vrot.lane.b32.xlu1 %v192_v18, %s508_s29 }
 0x150   :  { %377 = vrot.lane.b32.xlu0 %v187_v21, %s508_s29 }
 0x151   :  { %v472_v25 = vpop.f32.mrb[2].mxu1 }
 0x152   :  { %v366_v26 = vpop.f32.mrb[3].mxu1  ;;  %v372_v27 = vadd.f32 %v472_v25, %v438_v24 }
 0x153   :  { %387 = vrot.lane.b32.xlu1 %v282_v22, %s509_s5  ;;  %v367_v28 = vadd.f32 %v438_v24, %v366_v26 }
 0x154   :  { %385 = vrot.lane.b32.xlu0 %v277_v23, %s509_s5 }
 0x157   :  { %395 = vrot.lane.b32.xlu1 %v372_v27, %s510_s6 }
 0x158   :  { %393 = vrot.lane.b32.xlu0 %v367_v28, %s510_s6 }
 0x1c1   :  { %v380_v29 = vpop.permute.xlu1 %379 }
 0x1c2   :  { %v378_v30 = vpop.permute.xlu0 %377  ;;  %v401_v36 = vsel %vm399_vm1, %v102_v33, %v380_v29 }
 0x1c3   :  { %v400_v37 = vsel %vm399_vm1, %v97_v35, %v378_v30 }
 0x1c5   :  { %v388_v32 = vpop.permute.xlu1 %387 }
 0x1c6   :  { %v386_v34 = vpop.permute.xlu0 %385  ;;  %v403_v38 = vsel %vm23_vm0, %v401_v36, %v388_v32 }
 0x1c7   :  { %v402_v40 = vsel %vm23_vm0, %v400_v37, %v386_v34 }
 0x1c9   :  { %v396_v39 = vpop.permute.xlu1 %395 }
 0x1ca   :  { %v406_v41 = vsel %vm404_vm2, %v403_v38, %v396_v39  ;;  %v394_v42 = vpop.permute.xlu0 %393 }
 0x1cb   :  { %409 = vst.msk [vmem:[#allocation2 + $0x8] sm:$0xff] %vm407_vm3, %v406_v41  ;;  %v405_v43 = vsel %vm404_vm2, %v402_v40, %v394_v42 }
 0x1cc   :  { %408 = vst.msk [vmem:[#allocation2] sm:$0xff] %vm407_vm3, %v405_v43 }
 0x1cd   :  { %492 = shalt.err (!%p489_p4)
}
 0x1ce   :  { %s493_s13 = scalar_lea.hbm %s591_s3, 256 }
 0x1cf   :  { %p494_p5 = scmp.ne.s32.totalorder %s591_s3, %s493_s13  ;;  %p497_p6 = scmp.lt.u32.totalorder %s493_s13, %s591_s3 }
 0x1d1   :  { %p499_p7 = pnand %p497_p6, %p494_p5 }
 0x1d3   :  { %502 = shalt.err (!%p499_p7)
}
 0x1d4   :  { %s512_s18 = smov 128  }
 0x1d5   :  { %421 = dma.vmem_to_hbm [thread:$0]  %s416_s10, 256, %s591_s3, [#allocation3], %s512_s18, %s512_s18, %s509_s5  }
 0x1d6   :  { %503 = dma.done.wait [#allocation3], 256  }
 0x1d7   :  { %504 = vsyncadd [#allocation3], 4294967040 }
 0x1d8   :  { %425 = vsyncpa [#allocation3], 1 }

</bundles_post_ra>
